<compile_context>
chip_gen: v5e
topology: v5e:2x2
jax: 0.10.0
libtpu: 0.0.40
codegen_flags: <defaults>
</compile_context>

<pallas_src>
import functools

import jax
import jax.numpy as jnp
from jax.experimental import pallas as pl
from jax.experimental.pallas import tpu as pltpu


def _kl_div_kernel(x_ref, y_ref, w_ref, out_ref, *, n_rows, tile_n):
    x = x_ref[...].astype(jnp.float32)                 # [tile_n, C] log-probs
    y = y_ref[...].astype(jnp.float32) + 1e-16         # [tile_n, C] target distribution
    w = w_ref[...].astype(jnp.float32)                 # [tile_n, 1] per-row weight

    # nn.KLDivLoss(reduction='none') pointwise term, with the per-row weight folded in
    # so there is a single reduction per tile.
    weighted = (y * (jnp.log(y) - x)) * w              # [tile_n, C]

    # Mask padded rows of the ragged last tile (compile-time branch).
    if n_rows % tile_n != 0:
        row0 = pl.program_id(0) * tile_n
        row_ids = jax.lax.broadcasted_iota(jnp.int32, (tile_n, 1), 0) + row0
        weighted = jnp.where(row_ids < n_rows, weighted, 0.0)

    partial = jnp.sum(weighted)
    # Lane-dense (8, 128) block per grid step -> unmasked vector stores; the wrapper
    # reads element [0, 0] of each tile's block.
    out_ref[...] = jnp.full((8, 128), partial, dtype=jnp.float32)


def _vmem_capacity_bytes():
    try:
        info = pltpu.get_tpu_info()
        cap = getattr(info, "vmem_capacity_bytes", None)
        if cap:
            return int(cap)
    except Exception:
        pass
    return 64 * 1024 * 1024  # conservative default (v7x per-TensorCore VMEM)


def _pick_tile_n(n, c, itemsize):
    """Largest row tile whose double-buffered stream fits the per-generation VMEM."""
    vmem = _vmem_capacity_bytes()
    budget = vmem // 4                                   # headroom for 2x double-buffering
    per_row = 2 * 2 * c * itemsize + 2 * 4               # x & y (2 bufs each) + w (f32, 2 bufs)
    tile = budget // max(per_row, 1)
    tile = min(tile, 16384)                              # keep per-step latency reasonable
    if tile >= n:
        tile = n                                         # full-extent block: always legal
    else:
        tile = max(8, (tile // 8) * 8)                   # sublane-aligned
    vmem_limit = int(max(32 * 1024 * 1024, vmem // 2))
    return int(tile), vmem_limit


def kl_div_loss(x, y, hard_label, use_weight=False, _tile_n=None):
    """Pallas wrapper. x, y: [N, C] float (f32 or bf16); hard_label: [N] float."""
    n, c = x.shape
    itemsize = max(jnp.dtype(x.dtype).itemsize, jnp.dtype(y.dtype).itemsize)

    if use_weight:
        w1d = 1.0 / (hard_label.astype(jnp.float32) + 0.25)
        denom = jnp.sum(w1d)
    else:
        w1d = jnp.ones((n,), jnp.float32)
        denom = jnp.float32(n)
    w2d = w1d.reshape(n, 1)

    tile_n, vmem_limit = _pick_tile_n(n, c, itemsize)
    if _tile_n is not None:
        tile_n = int(_tile_n)
    num_tiles = pl.cdiv(n, tile_n)

    kernel = functools.partial(_kl_div_kernel, n_rows=n, tile_n=tile_n)
    partials = pl.pallas_call(
        kernel,
        out_shape=jax.ShapeDtypeStruct((num_tiles * 8, 128), jnp.float32),
        grid=(num_tiles,),
        in_specs=[
            pl.BlockSpec((tile_n, c), lambda i: (i, 0)),   # x: stream row tiles, full C
            pl.BlockSpec((tile_n, c), lambda i: (i, 0)),   # y: stream row tiles, full C
            pl.BlockSpec((tile_n, 1), lambda i: (i, 0)),   # per-row weights
        ],
        out_specs=pl.BlockSpec((8, 128), lambda i: (i, 0)),
        compiler_params=pltpu.CompilerParams(
            dimension_semantics=("parallel",),
            vmem_limit_bytes=vmem_limit,
        ),
    )(x, y, w2d)

    # Tiny epilogue in plain JAX: one partial per tile lives at (8*i, 0).
    return jnp.sum(partials[::8, 0]) / denom


if __name__ == "__main__":
    key = jax.random.PRNGKey(0)
    k1, k2, k3 = jax.random.split(key, 3)

    N, C = 8, 32  # batch size, number of distribution bins
    x = jax.nn.log_softmax(jax.random.normal(k1, (N, C), jnp.float32), axis=1)
    y = jax.nn.softmax(jax.random.normal(k2, (N, C), jnp.float32), axis=1)
    hard_label = jax.random.uniform(k3, (N,), jnp.float32, minval=20.0, maxval=80.0)

    def ref_loss(xx, yy, hh, use_weight):
        y_eps = yy + 1e-16
        per_row = (y_eps * (jnp.log(y_eps) - xx)).sum(axis=1)
        if use_weight:
            w = 1.0 / (hh + 0.25)
            return (per_row * w).sum() / w.sum()
        return per_row.sum() / yy.shape[0]

    # Unweighted path (hp.weighted_loss = False)
    loss = jax.block_until_ready(kl_div_loss(x, y, hard_label, use_weight=False))
    # Weighted path (hp.weighted_loss = True)
    loss_w = jax.block_until_ready(kl_div_loss(x, y, hard_label, use_weight=True))

    assert jnp.allclose(loss, ref_loss(x, y, hard_label, False), rtol=1e-5, atol=1e-6)
    assert jnp.allclose(loss_w, ref_loss(x, y, hard_label, True), rtol=1e-5, atol=1e-6)

    # Multi-tile ragged path: N not a multiple of the tile exercises the row mask
    # and the "parallel" partial-sum output.
    N2 = 12
    x2 = jax.nn.log_softmax(jax.random.normal(k1, (N2, C), jnp.float32), axis=1)
    y2 = jax.nn.softmax(jax.random.normal(k2, (N2, C), jnp.float32), axis=1)
    h2 = jax.random.uniform(k3, (N2,), jnp.float32, minval=20.0, maxval=80.0)
    loss2 = jax.block_until_ready(kl_div_loss(x2, y2, h2, use_weight=True, _tile_n=8))
    loss3 = jax.block_until_ready(kl_div_loss(x2, y2, h2, use_weight=False, _tile_n=8))
    assert jnp.allclose(loss2, ref_loss(x2, y2, h2, True), rtol=1e-5, atol=1e-6)
    assert jnp.allclose(loss3, ref_loss(x2, y2, h2, False), rtol=1e-5, atol=1e-6)

    print("KERNEL_OK")
</pallas_src>

<mosaic_0001>
module attributes {stable_mosaic.version = 11 : i64} {
  func.func @_kl_div_kernel(%arg0: i32, %arg1: memref<8x32xf32, #tpu.memory_space<vmem>>, %arg2: memref<8x32xf32, #tpu.memory_space<vmem>>, %arg3: memref<8x1xf32, #tpu.memory_space<vmem>>, %arg4: memref<8x128xf32, #tpu.memory_space<vmem>>) attributes {dimension_semantics = [#tpu.dimension_semantics<parallel>], iteration_bounds = array<i64: 1>, scalar_prefetch = 0 : i64, scratch_operands = 0 : i64, tpu.core_type = #tpu.core_type<tc>, window_params = [{transform_indices = @transform_0, window_bounds = array<i64: 8, 32>}, {transform_indices = @transform_1, window_bounds = array<i64: 8, 32>}, {transform_indices = @transform_2, window_bounds = array<i64: 8, 1>}, {transform_indices = @transform_3, window_bounds = array<i64: 8, 128>}]} {
    %c0 = arith.constant 0 : index
    %c0_0 = arith.constant 0 : index
    %0 = vector.load %arg1[%c0, %c0_0] : memref<8x32xf32, #tpu.memory_space<vmem>>, vector<8x32xf32>
    %c0_1 = arith.constant 0 : index
    %c0_2 = arith.constant 0 : index
    %1 = vector.load %arg2[%c0_1, %c0_2] : memref<8x32xf32, #tpu.memory_space<vmem>>, vector<8x32xf32>
    %cst = arith.constant 1.000000e-16 : f32
    %2 = vector.broadcast %cst : f32 to vector<8x32xf32>
    %3 = arith.addf %1, %2 : vector<8x32xf32>
    %c0_3 = arith.constant 0 : index
    %c0_4 = arith.constant 0 : index
    %4 = vector.load %arg3[%c0_3, %c0_4] : memref<8x1xf32, #tpu.memory_space<vmem>>, vector<8x1xf32>
    %5 = math.log %3 : vector<8x32xf32>
    %6 = arith.subf %5, %0 : vector<8x32xf32>
    %7 = arith.mulf %3, %6 : vector<8x32xf32>
    %8 = vector.broadcast %4 : vector<8x1xf32> to vector<8x32xf32>
    %9 = arith.mulf %7, %8 : vector<8x32xf32>
    %10 = vector.shape_cast %9 : vector<8x32xf32> to vector<1x8x32xf32>
    %cst_5 = arith.constant dense<0.000000e+00> : vector<1xf32>
    %11 = vector.multi_reduction <add>, %10, %cst_5 [1, 2] : vector<1x8x32xf32> to vector<1xf32>
    %12 = vector.shape_cast %11 : vector<1xf32> to vector<1x1x1xf32>
    %13 = vector.extract %12[0, 0, 0] : f32 from vector<1x1x1xf32>
    %14 = vector.broadcast %13 : f32 to vector<8x128xf32>
    %c0_6 = arith.constant 0 : index
    %c0_7 = arith.constant 0 : index
    %15 = vector.load %arg4[%c0_6, %c0_7] : memref<8x128xf32, #tpu.memory_space<vmem>>, vector<8x128xf32>
    tpu.vector_store %arg4[%c0_6, %c0_7], %14 {strides = array<i32>} : memref<8x128xf32, #tpu.memory_space<vmem>>, vector<8x128xf32>,
    return
  }
  func.func @transform_0(%arg0: i32) -> (i32, i32) {
    %c0_i32 = arith.constant 0 : i32
    %c0_i32_0 = arith.constant 0 : i32
    return %arg0, %c0_i32 : i32, i32
  }
  func.func @transform_1(%arg0: i32) -> (i32, i32) {
    %c0_i32 = arith.constant 0 : i32
    %c0_i32_0 = arith.constant 0 : i32
    return %arg0, %c0_i32 : i32, i32
  }
  func.func @transform_2(%arg0: i32) -> (i32, i32) {
    %c0_i32 = arith.constant 0 : i32
    %c0_i32_0 = arith.constant 0 : i32
    return %arg0, %c0_i32 : i32, i32
  }
  func.func @transform_3(%arg0: i32) -> (i32, i32) {
    %c0_i32 = arith.constant 0 : i32
    %c0_i32_0 = arith.constant 0 : i32
    return %arg0, %c0_i32 : i32, i32
  }
}

</mosaic_0001>

<bundles_post_ra>
// kernel: tpu_custom_call.1
= control target key start
LH: loop header
LB: loop body
LE: loop exit
PB: predicated region body
PF: predicated region fallthrough
CT: control target
= control target key end

     0   :  { %8 = vsyncpa [#allocation3], 0  ;;  %s168_s0 = inlined_call_operand.vmem [shape: f32[8,32], index: 0, kind: input, shape index: {}]   ;;  %s169_s1 = inlined_call_operand.hbm [shape: f32[8,32], index: 1, kind: input, shape index: {}]   ;;  %s170_s2 = inlined_call_operand.vmem [shape: f32[8,1], index: 2, kind: input, shape index: {}]   ;;  %s171_s3 = inlined_call_operand.hbm [shape: f32[8,128], index: 3, kind: output, shape index: {}]  }
   0x1   :  { %9 = vsyncpa [#allocation4], 0  ;;  %s17_s14 = sshll.u32 %s169_s1, 4  ;;  %s133_s15 = smov [#allocation2]   ;;  %s18_s14 = int_to_ptr.hbm [resolvable:$true] %s17_s14 }
   0x2   :  { %s19_s16 = sshll.u32 %s133_s15, 4  ;;  %s20_s16 = int_to_ptr.vmem [resolvable:$true] %s19_s16 }
   0x3   :  { %22 = dma.hbm_to_vmem [thread:$0]  %s18_s14, 128, %s20_s16, [#allocation3]  }
   0x4   :  { %129 = dma.done.wait [#allocation3], 128  }
   0x5   :  { %130 = vsyncadd [#allocation3], 4294967168  ;;  %v134_v0 = vmov 0   ;;  %v32_v1 = vld [vmem:[%s170_s2] sm:$0xff]  ;;  %vm43_vm0 = vcmask 261120   ;;  %s135_s2 = smov [#allocation5]  }
   0x6   :  { %78 = vset.pattern.permute.xlu0 %v134_v0  ;;  %v30_v2 = vld [vmem:[#allocation2] sm:$0xff]  ;;  %s61_s20 = sshll.u32 %s135_s2, 4  ;;  %s62_s20 = int_to_ptr.vmem [resolvable:$true] %s61_s20 }
   0x7   :  { %39 = vperm.xlu0 %78, %v32_v1   ;;  %v31_v3 = vadd.f32 1e-16, %v30_v2  ;;  %v29_v6 = vld [vmem:[%s168_s0] sm:$0xff]  ;;  %s63_s0 = sshll.u32 %s171_s3, 4  ;;  %s64_s0 = int_to_ptr.hbm [resolvable:$true] %s63_s0 }
   0x9   :  { %79 = vlog2.f32 %v31_v3 }
   0xf   :  { %v80_v4 = vpop.eup %79 }
  0x10   :  { %v34_v5 = vmul.f32 0.6931472, %v80_v4 }
  0x12   :  { %v35_v7 = vsub.f32 %v34_v5, %v29_v6 }
  0x14   :  { %v36_v8 = vmul.f32 %v35_v7, %v31_v3 }
  0x79   :  { %v40_v9 = vpop.permute.xlu0 %39 }
  0x7a   :  { %v42_v10 = vmul.f32 %v40_v9, %v36_v8 }
  0x7c   :  { %v44_v11 = vsel %vm43_vm0, %v42_v10, 0.0 }
  0x7d   :  { %45 = vadd.xlane.f32.xlu0 %v44_v11 }
  0xf0   :  { %v46_v12 = vpop.xlane.xlu0 %45 }
  0xf1   :  { %v47_v13 = vrot.slane %v46_v12, 4 }
  0xf3   :  { %v48_v14 = vadd.f32 %v47_v13, %v46_v12 }
  0xf5   :  { %v49_v15 = vrot.slane %v48_v14, 2 }
  0xf7   :  { %v50_v16 = vadd.f32 %v49_v15, %v48_v14 }
  0xf9   :  { %v51_v17 = vrot.slane %v50_v16, 1 }
  0xfb   :  { %v52_v18 = vadd.f32 %v51_v17, %v50_v16 }
  0xfd   :  { %73 = vpush %v52_v18 }
 0x12e   :  { %s74_s23 = spop %73 }
 0x12f   :  { %v54_v19 = vstv %s74_s23 }
 0x130   :  { %55 = vst [vmem:[#allocation5] sm:$0xff] %v54_v19 }
 0x131   :  { %66 = dma.vmem_to_hbm [thread:$0]  %s62_s20, 128, %s64_s0, [#allocation4]  }
 0x132   :  { %131 = dma.done.wait [#allocation4], 128  }
 0x133   :  { %132 = vsyncadd [#allocation4], 4294967168 }
 0x134   :  { %71 = vsyncpa [#allocation3], 1 }
 0x135   :  { %72 = vsyncpa [#allocation4], 1 }

</bundles_post_ra>
